<compile_context>
chip_gen: v7x
topology: tpu7x:2x2x1
jax: 0.10.0
libtpu: 0.0.40
codegen_flags: <defaults>
</compile_context>

<pallas_src>
import functools

import jax
import jax.numpy as jnp
from jax.experimental import pallas as pl
from jax.experimental.pallas import tpu as pltpu


def qvalue_kernel(x_ref, a_ref, w1x_ref, w1a_ref, b1_ref, w2_ref, b2_ref,
                  w3r_ref, b3_ref, out_ref):
    # fc1 + ReLU, with the concat fused:  cat([x,a]) @ w1 == x @ w1x + a @ w1a
    h1 = (jnp.dot(x_ref[...], w1x_ref[...], preferred_element_type=jnp.float32)
          + jnp.dot(a_ref[...], w1a_ref[...], preferred_element_type=jnp.float32)
          + b1_ref[...])
    h1 = jnp.maximum(h1, 0.0)

    # fc2 + ReLU (f32 accumulation on the MXU)
    h2 = jnp.dot(h1.astype(w2_ref.dtype), w2_ref[...],
                 preferred_element_type=jnp.float32) + b2_ref[...]
    h2 = jnp.maximum(h2, 0.0)

    # fc_out: only 1 of 128/256 MXU output columns would be used, so do it on
    # the VPU (elementwise mul) + XLU (lane reduce) instead; b3 is an SMEM scalar.
    out = jnp.sum(h2 * w3r_ref[...].astype(jnp.float32),
                  axis=-1, keepdims=True) + b3_ref[0, 0]
    out_ref[...] = out.astype(out_ref.dtype)


def _round_up(n, m):
    return pl.cdiv(n, m) * m


def qvalue_forward(x, a, params, *, tile_b=512, compute_dtype=jnp.float32):
    """x: [B, obs_dim], a: [B, act_dim]. Returns [B, 1] float32 Q-values."""
    w1, b1, w2, b2, w3, b3 = params
    B, obs_dim = x.shape
    act_dim = a.shape[1]
    hidden = w1.shape[1]

    # Split w1 so the concat is fused into fc1 (no HBM write/read of `cat`).
    w1x = w1[:obs_dim]
    w1a = w1[obs_dim:]

    # Zero-pad feature (K) dims to multiples of 8 (zero rows -> no math change).
    def pad_feat(act, w):
        k = act.shape[1]
        kp = _round_up(k, 8)
        if kp != k:
            act = jnp.pad(act, ((0, 0), (0, kp - k)))
            w = jnp.pad(w, ((0, kp - k), (0, 0)))
        return act, w

    x, w1x = pad_feat(x, w1x)
    a, w1a = pad_feat(a, w1a)

    # Batch tiling: 512 (multiple of 128 and 256, good for v5e/v6e/v7x MXU
    # geometry) for large batches; a single sublane-aligned tile for tiny ones.
    tb = tile_b if B >= tile_b else _round_up(B, 8)
    Bp = _round_up(B, tb)
    if Bp != B:
        x = jnp.pad(x, ((0, Bp - B), (0, 0)))
        a = jnp.pad(a, ((0, Bp - B), (0, 0)))

    # Optional bf16 compute path (keeps f32 MXU accumulation / f32 bias+ReLU).
    x = x.astype(compute_dtype)
    a = a.astype(compute_dtype)
    w1x = w1x.astype(compute_dtype)
    w1a = w1a.astype(compute_dtype)
    w2c = w2.astype(compute_dtype)
    w3r = w3.reshape(1, hidden).astype(compute_dtype)
    b1c = b1.astype(jnp.float32)
    b2c = b2.astype(jnp.float32)
    b3s = b3.reshape(1, 1).astype(jnp.float32)

    kx = x.shape[1]
    ka = a.shape[1]
    grid = (Bp // tb,)

    # Weight / bias specs use constant index maps -> resident in VMEM across
    # all grid steps (no re-DMA per tile).
    const = lambda shp: pl.BlockSpec(shp, lambda i: (0, 0))

    out = pl.pallas_call(
        qvalue_kernel,
        out_shape=jax.ShapeDtypeStruct((Bp, 1), jnp.float32),
        grid=grid,
        in_specs=[
            pl.BlockSpec((tb, kx), lambda i: (i, 0)),      # x tile
            pl.BlockSpec((tb, ka), lambda i: (i, 0)),      # a tile
            const((kx, hidden)),                           # w1[:obs]
            const((ka, hidden)),                           # w1[obs:]
            const((1, hidden)),                            # b1
            const((hidden, hidden)),                       # w2
            const((1, hidden)),                            # b2
            const((1, hidden)),                            # w3 (as a row)
            pl.BlockSpec(memory_space=pltpu.MemorySpace.SMEM),  # b3 scalar
        ],
        out_specs=pl.BlockSpec((tb, 1), lambda i: (i, 0)),
        compiler_params=pltpu.CompilerParams(
            dimension_semantics=("parallel",)),
    )(x, a, w1x, w1a, b1c, w2c, b2c, w3r, b3s)

    return out[:B]


def init_params(key, obs_dim, act_dim, hidden_dim=128):
    """Deterministic init mimicking torch.nn.Linear default U[-1/sqrt(fan_in), +]."""
    def linear(k, fan_in, fan_out):
        kw, kb = jax.random.split(k)
        bound = 1.0 / jnp.sqrt(fan_in)
        w = jax.random.uniform(kw, (fan_in, fan_out), jnp.float32, -bound, bound)
        b = jax.random.uniform(kb, (1, fan_out), jnp.float32, -bound, bound)
        return w, b

    k1, k2, k3 = jax.random.split(key, 3)
    w1, b1 = linear(k1, obs_dim + act_dim, hidden_dim)
    w2, b2 = linear(k2, hidden_dim, hidden_dim)
    w3, b3 = linear(k3, hidden_dim, 1)
    return (w1, b1, w2, b2, w3, b3)


if __name__ == "__main__":
    obs_dim, act_dim, hidden_dim = 16, 8, 128
    batch = 2

    key = jax.random.PRNGKey(0)
    k_params, k_x, k_a = jax.random.split(key, 3)

    params = init_params(k_params, obs_dim, act_dim, hidden_dim)
    x = jax.random.normal(k_x, (batch, obs_dim), jnp.float32)
    a = jax.random.normal(k_a, (batch, act_dim), jnp.float32)

    # Demo runs the f32 path (tight tolerance); pass compute_dtype=jnp.bfloat16
    # for MXU-throughput mode at real batch sizes (accumulation stays f32).
    q = qvalue_forward(x, a, params)
    q = jax.block_until_ready(q)

    # Pure-JAX reference of the same forward pass (matches the PyTorch module).
    w1, b1, w2, b2, w3, b3 = params
    cat = jnp.concatenate([x, a], axis=1)
    h1 = jnp.maximum(cat @ w1 + b1, 0.0)
    h2 = jnp.maximum(h1 @ w2 + b2, 0.0)
    ref = h2 @ w3 + b3

    assert q.shape == (batch, 1)
    assert jnp.allclose(q, ref, atol=1e-5, rtol=1e-5)

    print("KERNEL_OK")
</pallas_src>

<mosaic_0001>
module attributes {stable_mosaic.version = 11 : i64} {
  func.func @qvalue_kernel(%arg0: i32, %arg1: memref<8x16xf32, #tpu.memory_space<vmem>>, %arg2: memref<8x8xf32, #tpu.memory_space<vmem>>, %arg3: memref<16x128xf32, #tpu.memory_space<vmem>>, %arg4: memref<8x128xf32, #tpu.memory_space<vmem>>, %arg5: memref<1x128xf32, #tpu.memory_space<vmem>>, %arg6: memref<128x128xf32, #tpu.memory_space<vmem>>, %arg7: memref<1x128xf32, #tpu.memory_space<vmem>>, %arg8: memref<1x128xf32, #tpu.memory_space<vmem>>, %arg9: memref<1x1xf32, #tpu.memory_space<smem>>, %arg10: memref<8x1xf32, #tpu.memory_space<vmem>>) attributes {dimension_semantics = [#tpu.dimension_semantics<parallel>], iteration_bounds = array<i64: 1>, scalar_prefetch = 0 : i64, scratch_operands = 0 : i64, tpu.core_type = #tpu.core_type<tc>, window_params = [{transform_indices = @transform_0, window_bounds = array<i64: 8, 16>}, {transform_indices = @transform_1, window_bounds = array<i64: 8, 8>}, {pipeline_mode = #tpu.pipeline_mode<synchronous>, transform_indices = @transform_2, window_bounds = array<i64: 16, 128>}, {pipeline_mode = #tpu.pipeline_mode<synchronous>, transform_indices = @transform_3, window_bounds = array<i64: 8, 128>}, {pipeline_mode = #tpu.pipeline_mode<synchronous>, transform_indices = @transform_4, window_bounds = array<i64: 1, 128>}, {pipeline_mode = #tpu.pipeline_mode<synchronous>, transform_indices = @transform_5, window_bounds = array<i64: 128, 128>}, {pipeline_mode = #tpu.pipeline_mode<synchronous>, transform_indices = @transform_6, window_bounds = array<i64: 1, 128>}, {pipeline_mode = #tpu.pipeline_mode<synchronous>, transform_indices = @transform_7, window_bounds = array<i64: 1, 128>}, {transform_indices = @transform_8, window_bounds = array<i64: 1, 1>}, {transform_indices = @transform_9, window_bounds = array<i64: 8, 1>}]} {
    %c0 = arith.constant 0 : index
    %c0_0 = arith.constant 0 : index
    %0 = vector.load %arg1[%c0, %c0_0] : memref<8x16xf32, #tpu.memory_space<vmem>>, vector<8x16xf32>
    %c0_1 = arith.constant 0 : index
    %c0_2 = arith.constant 0 : index
    %1 = vector.load %arg3[%c0_1, %c0_2] : memref<16x128xf32, #tpu.memory_space<vmem>>, vector<16x128xf32>
    %cst = arith.constant dense<0.000000e+00> : vector<8x128xf32>
    %2 = tpu.matmul %0, %1, %cst {dimension_numbers = #tpu.dot_dimension_numbers<[1], [0], [0], [1], [0, 0, 1, 1], [], []>} : vector<8x16xf32>, vector<16x128xf32>, vector<8x128xf32> -> vector<8x128xf32>
    %c0_3 = arith.constant 0 : index
    %c0_4 = arith.constant 0 : index
    %3 = vector.load %arg2[%c0_3, %c0_4] : memref<8x8xf32, #tpu.memory_space<vmem>>, vector<8x8xf32>
    %c0_5 = arith.constant 0 : index
    %c0_6 = arith.constant 0 : index
    %4 = vector.load %arg4[%c0_5, %c0_6] : memref<8x128xf32, #tpu.memory_space<vmem>>, vector<8x128xf32>
    %cst_7 = arith.constant dense<0.000000e+00> : vector<8x128xf32>
    %5 = tpu.matmul %3, %4, %cst_7 {dimension_numbers = #tpu.dot_dimension_numbers<[1], [0], [0], [1], [0, 0, 1, 1], [], []>} : vector<8x8xf32>, vector<8x128xf32>, vector<8x128xf32> -> vector<8x128xf32>
    %6 = arith.addf %2, %5 : vector<8x128xf32>
    %c0_8 = arith.constant 0 : index
    %c0_9 = arith.constant 0 : index
    %7 = vector.load %arg5[%c0_8, %c0_9] : memref<1x128xf32, #tpu.memory_space<vmem>>, vector<1x128xf32>
    %8 = vector.broadcast %7 : vector<1x128xf32> to vector<8x128xf32>
    %9 = arith.addf %6, %8 : vector<8x128xf32>
    %cst_10 = arith.constant 0.000000e+00 : f32
    %10 = vector.broadcast %cst_10 : f32 to vector<8x128xf32>
    %11 = arith.maximumf %9, %10 : vector<8x128xf32>
    %c0_11 = arith.constant 0 : index
    %c0_12 = arith.constant 0 : index
    %12 = vector.load %arg6[%c0_11, %c0_12] : memref<128x128xf32, #tpu.memory_space<vmem>>, vector<128x128xf32>
    %cst_13 = arith.constant dense<0.000000e+00> : vector<8x128xf32>
    %13 = tpu.matmul %11, %12, %cst_13 {dimension_numbers = #tpu.dot_dimension_numbers<[1], [0], [0], [1], [0, 0, 1, 1], [], []>} : vector<8x128xf32>, vector<128x128xf32>, vector<8x128xf32> -> vector<8x128xf32>
    %c0_14 = arith.constant 0 : index
    %c0_15 = arith.constant 0 : index
    %14 = vector.load %arg7[%c0_14, %c0_15] : memref<1x128xf32, #tpu.memory_space<vmem>>, vector<1x128xf32>
    %15 = vector.broadcast %14 : vector<1x128xf32> to vector<8x128xf32>
    %16 = arith.addf %13, %15 : vector<8x128xf32>
    %cst_16 = arith.constant 0.000000e+00 : f32
    %17 = vector.broadcast %cst_16 : f32 to vector<8x128xf32>
    %18 = arith.maximumf %16, %17 : vector<8x128xf32>
    %c0_17 = arith.constant 0 : index
    %c0_18 = arith.constant 0 : index
    %19 = vector.load %arg8[%c0_17, %c0_18] : memref<1x128xf32, #tpu.memory_space<vmem>>, vector<1x128xf32>
    %20 = vector.broadcast %19 : vector<1x128xf32> to vector<8x128xf32>
    %21 = arith.mulf %18, %20 : vector<8x128xf32>
    %cst_19 = arith.constant dense<0.000000e+00> : vector<8xf32>
    %22 = vector.multi_reduction <add>, %21, %cst_19 [1] : vector<8x128xf32> to vector<8xf32>
    %23 = vector.shape_cast %22 : vector<8xf32> to vector<8x1xf32>
    %c0_20 = arith.constant 0 : index
    %c0_21 = arith.constant 0 : index
    %24 = memref.load %arg9[%c0_20, %c0_21] : memref<1x1xf32, #tpu.memory_space<smem>>
    %25 = vector.broadcast %24 : f32 to vector<8x1xf32>
    %26 = arith.addf %23, %25 : vector<8x1xf32>
    %c0_22 = arith.constant 0 : index
    %c0_23 = arith.constant 0 : index
    %27 = vector.load %arg10[%c0_22, %c0_23] : memref<8x1xf32, #tpu.memory_space<vmem>>, vector<8x1xf32>
    tpu.vector_store %arg10[%c0_22, %c0_23], %26 {strides = array<i32>} : memref<8x1xf32, #tpu.memory_space<vmem>>, vector<8x1xf32>,
    return
  }
  func.func @transform_0(%arg0: i32) -> (i32, i32) {
    %c0_i32 = arith.constant 0 : i32
    %c0_i32_0 = arith.constant 0 : i32
    return %arg0, %c0_i32 : i32, i32
  }
  func.func @transform_1(%arg0: i32) -> (i32, i32) {
    %c0_i32 = arith.constant 0 : i32
    %c0_i32_0 = arith.constant 0 : i32
    return %arg0, %c0_i32 : i32, i32
  }
  func.func @transform_2(%arg0: i32) -> (i32, i32) {
    %c0_i32 = arith.constant 0 : i32
    %c0_i32_0 = arith.constant 0 : i32
    %c0_i32_1 = arith.constant 0 : i32
    return %c0_i32, %c0_i32_0 : i32, i32
  }
  func.func @transform_3(%arg0: i32) -> (i32, i32) {
    %c0_i32 = arith.constant 0 : i32
    %c0_i32_0 = arith.constant 0 : i32
    %c0_i32_1 = arith.constant 0 : i32
    return %c0_i32, %c0_i32_0 : i32, i32
  }
  func.func @transform_4(%arg0: i32) -> (i32, i32) {
    %c0_i32 = arith.constant 0 : i32
    %c0_i32_0 = arith.constant 0 : i32
    %c0_i32_1 = arith.constant 0 : i32
    return %c0_i32, %c0_i32_0 : i32, i32
  }
  func.func @transform_5(%arg0: i32) -> (i32, i32) {
    %c0_i32 = arith.constant 0 : i32
    %c0_i32_0 = arith.constant 0 : i32
    %c0_i32_1 = arith.constant 0 : i32
    return %c0_i32, %c0_i32_0 : i32, i32
  }
  func.func @transform_6(%arg0: i32) -> (i32, i32) {
    %c0_i32 = arith.constant 0 : i32
    %c0_i32_0 = arith.constant 0 : i32
    %c0_i32_1 = arith.constant 0 : i32
    return %c0_i32, %c0_i32_0 : i32, i32
  }
  func.func @transform_7(%arg0: i32) -> (i32, i32) {
    %c0_i32 = arith.constant 0 : i32
    %c0_i32_0 = arith.constant 0 : i32
    %c0_i32_1 = arith.constant 0 : i32
    return %c0_i32, %c0_i32_0 : i32, i32
  }
  func.func @transform_8(%arg0: i32) -> (i32, i32) {
    %c0_i32 = arith.constant 0 : i32
    %c0_i32_0 = arith.constant 0 : i32
    %c0_i32_1 = arith.constant 0 : i32
    return %c0_i32, %c0_i32_0 : i32, i32
  }
  func.func @transform_9(%arg0: i32) -> (i32, i32) {
    %c0_i32 = arith.constant 0 : i32
    %c0_i32_0 = arith.constant 0 : i32
    return %arg0, %c0_i32 : i32, i32
  }
}

</mosaic_0001>

<bundles_post_ra>
// kernel: tpu_custom_call.1
= control target key start
LH: loop header
LB: loop body
LE: loop exit
PB: predicated region body
PF: predicated region fallthrough
CT: control target
= control target key end

     0   :  { %15 = vsyncpa [#allocation4], 0  ;;  %s694_s0 = inlined_call_operand.hbm [shape: f32[8,16], index: 0, kind: input, shape index: {}]   ;;  %s695_s1 = inlined_call_operand.hbm [shape: f32[8,8], index: 1, kind: input, shape index: {}]   ;;  %s696_s2 = inlined_call_operand.hbm [shape: f32[16,128], index: 2, kind: input, shape index: {}]   ;;  %s697_s3 = inlined_call_operand.vmem [shape: f32[8,128], index: 3, kind: input, shape index: {}]   ;;  %s698_s4 = inlined_call_operand.vmem [shape: f32[1,128], index: 4, kind: input, shape index: {}]   ;;  %s699_s5 = inlined_call_operand.hbm [shape: f32[128,128], index: 5, kind: input, shape index: {}]   ;;  %s700_s6 = inlined_call_operand.vmem [shape: f32[1,128], index: 6, kind: input, shape index: {}]   ;;  %s701_s7 = inlined_call_operand.vmem [shape: f32[1,128], index: 7, kind: input, shape index: {}]   ;;  %s702_s8 = inlined_call_operand.<no memory space> [shape: f32[1,1], index: 8, kind: input, shape index: {}]   ;;  %s703_s9 = inlined_call_operand.vmem [shape: f32[8,1], index: 9, kind: output, shape index: {}]  }
   0x1   :  { %16 = vsyncpa [#allocation6], 0 }
   0x2   :  { %17 = vsyncpa [#allocation9], 0  ;;  %s566_s30 = smov [#allocation5]   ;;  %s567_s11 = smov [#allocation3]  }
   0x3   :  { %s34_s10 = sshll.u32 %s566_s30, 4  ;;  %s24_s12 = sshll.u32 %s567_s11, 4  ;;  %s35_s10 = int_to_ptr.vmem [resolvable:$true] %s34_s10  ;;  %s25_s12 = int_to_ptr.vmem [resolvable:$true] %s24_s12 }
   0x4   :  { %s472_s15 = scalar_lea.hbm %s695_s1, 128 }
   0x5   :  { %p473_p0 = scmp.ne.s32.totalorder %s695_s1, %s472_s15  ;;  %p476_p1 = scmp.lt.u32.totalorder %s472_s15, %s695_s1 }
   0x7   :  { %p478_p2 = pnand %p476_p1, %p473_p0 }
   0x9   :  { %481 = shalt.err (!%p478_p2)
}
   0xa   :  { %s482_s20 = scalar_lea.vmem %s35_s10, 128  ;;  %p487_p4 = scmp.lt.s32.totalorder %s35_s10, %s35_s10 }
   0xb   :  { %p483_p3 = scmp.ne.s32.totalorder %s35_s10, %s482_s20  ;;  %p488_p5 = scmp.lt.s32.totalorder %s482_s20, %s482_s20 }
   0xd   :  { %p489_p6 = por %p488_p5, %p487_p4 }
   0xf   :  { %p490_p7 = pnand %p489_p6, %p483_p3 }
  0x11   :  { %493 = shalt.err (!%p490_p7)
}
  0x12   :  { %37 = dma.hbm_to_vmem [thread:$0]  %s695_s1, 128, %s35_s10, [#allocation6]  }
  0x13   :  { %s494_s25 = scalar_lea.hbm %s694_s0, 128 }
  0x14   :  { %p495_p8 = scmp.ne.s32.totalorder %s694_s0, %s494_s25  ;;  %p498_p9 = scmp.lt.u32.totalorder %s494_s25, %s694_s0 }
  0x16   :  { %p500_p10 = pnand %p498_p9, %p495_p8 }
  0x18   :  { %503 = shalt.err (!%p500_p10)
}
  0x19   :  { %s504_s30 = scalar_lea.vmem %s25_s12, 128  ;;  %p509_p12 = scmp.lt.s32.totalorder %s25_s12, %s25_s12 }
  0x1a   :  { %p505_p11 = scmp.ne.s32.totalorder %s25_s12, %s504_s30  ;;  %p510_p13 = scmp.lt.s32.totalorder %s504_s30, %s504_s30 }
  0x1c   :  { %p511_p0 = por %p510_p13, %p509_p12 }
  0x1e   :  { %p512_p1 = pnand %p511_p0, %p505_p11 }
  0x20   :  { %515 = shalt.err (!%p512_p1)
}
  0x21   :  { %27 = dma.hbm_to_vmem [thread:$0]  %s694_s0, 128, %s25_s12, [#allocation4]  }
  0x22   :  { %s568_s11 = smov [#allocation7]   ;;  %s516_s16 = scalar_lea.hbm %s696_s2, 256 }
  0x23   :  { %s43_s13 = sshll.u32 %s568_s11, 4  ;;  %p517_p2 = scmp.ne.s32.totalorder %s696_s2, %s516_s16  ;;  %s44_s13 = int_to_ptr.vmem [resolvable:$true] %s43_s13 }
  0x24   :  { %p520_p3 = scmp.lt.u32.totalorder %s516_s16, %s696_s2 }
  0x26   :  { %p522_p4 = pnand %p520_p3, %p517_p2 }
  0x28   :  { %525 = shalt.err (!%p522_p4)
}
  0x29   :  { %s526_s21 = scalar_lea.vmem %s44_s13, 256  ;;  %p531_p6 = scmp.lt.s32.totalorder %s44_s13, %s44_s13 }
  0x2a   :  { %p527_p5 = scmp.ne.s32.totalorder %s44_s13, %s526_s21  ;;  %p532_p7 = scmp.lt.s32.totalorder %s526_s21, %s526_s21 }
  0x2c   :  { %p533_p8 = por %p532_p7, %p531_p6 }
  0x2e   :  { %p534_p9 = pnand %p533_p8, %p527_p5 }
  0x30   :  { %537 = shalt.err (!%p534_p9)
}
  0x31   :  { %s569_s0 = smov 128   ;;  %s570_s12 = smov 8  }
  0x32   :  { %49 = dma.hbm_to_vmem [thread:$0]  %s696_s2, 256, %s44_s13, [#allocation6], %s569_s0, %s569_s0, %s570_s12  }
  0x33   :  { %s571_s24 = smov [#allocation8]   ;;  %s538_s28 = scalar_lea.hbm %s699_s5, 2048 }
  0x34   :  { %s59_s25 = sshll.u32 %s571_s24, 4  ;;  %p539_p10 = scmp.ne.s32.totalorder %s699_s5, %s538_s28  ;;  %s60_s25 = int_to_ptr.vmem [resolvable:$true] %s59_s25 }
  0x35   :  { %p542_p11 = scmp.lt.u32.totalorder %s538_s28, %s699_s5 }
  0x37   :  { %p544_p12 = pnand %p542_p11, %p539_p10 }
  0x39   :  { %547 = shalt.err (!%p544_p12)
}
  0x3a   :  { %s548_s11 = scalar_lea.vmem %s60_s25, 2048  ;;  %p553_p0 = scmp.lt.s32.totalorder %s60_s25, %s60_s25 }
  0x3b   :  { %p549_p13 = scmp.ne.s32.totalorder %s60_s25, %s548_s11  ;;  %p554_p1 = scmp.lt.s32.totalorder %s548_s11, %s548_s11 }
  0x3d   :  { %p555_p2 = por %p554_p1, %p553_p0 }
  0x3f   :  { %p556_p3 = pnand %p555_p2, %p549_p13 }
  0x41   :  { %559 = shalt.err (!%p556_p3)
}
  0x42   :  { %65 = dma.hbm_to_vmem [thread:$0]  %s699_s5, 2048, %s60_s25, [#allocation9], %s569_s0, %s569_s0, %s570_s12  }
  0x43   :  { %560 = dma.done.wait [#allocation4], 128  }
  0x44   :  { %561 = vsyncadd [#allocation4], 4294967168 }
  0x45   :  { %562 = dma.done.wait [#allocation6], 384  }
  0x46   :  { %563 = vsyncadd [#allocation6], 4294966912 }
  0x47   :  { %564 = dma.done.wait [#allocation9], 2048  }
  0x48   :  { %565 = vsyncadd [#allocation9], 4294965248  ;;  %v572_v0 = vmov 0.0   ;;  %vm573_vm0 = vmmov 0   ;;  %v574_v1 = vmov 0.0|0.0   ;;  %vm89_vm1 = vcmask 64512  }
  0x49   :  { %389 = vmatprep.subr.mxu1 %v572_v0  ;;  %391 = vmatprep.mubr.msk.f32.mxu1 %vm573_vm0, %v572_v0  ;;  %v88_v2 = vld [vmem:[%s697_s3] sm:$0xff]  ;;  %v87_v3 = vld [vmem:[#allocation5] sm:$0xff]  ;;  %v85_v4 = vld [vmem:[#allocation7] sm:$0xff]  ;;  %vm163_vm2 = vcmask 130048   ;;  %v351_v47 = vstv %s702_s8  ;;  %vm353_vm3 = vcmask 7168  }
  0x4a   :  { %439 = vmatprep.subr.bf16.mxu0 %v574_v1  ;;  %433 = vmatprep.mubr.msk.f32.mxu0 %vm573_vm0, %v572_v0  ;;  %v86_v5 = vld [vmem:[#allocation7 + $0x8] sm:$0xff]  ;;  %v246_v6 = vld [vmem:[#allocation8] sm:$0xff]  ;;  %v247_v8 = vld [vmem:[#allocation8 + $0x8] sm:$0xff] }
  0x4b   :  { %390 = vmatpush3.msra.mxu1 %v88_v2  ;;  %v437_v7 = vpack.c.bf16 %v86_v5, %v85_v4  ;;  %v248_v9 = vld [vmem:[#allocation8 + $0x10] sm:$0xff]  ;;  %v249_v10 = vld [vmem:[#allocation8 + $0x18] sm:$0xff]  ;;  %v440_v11 = vpack.c.bf16 %v247_v8, %v246_v6  ;;  %v84_v12 = vld [vmem:[#allocation3] sm:$0xff] }
  0x4c   :  { %392 = vmatmul.mubr.msk.f32.vlgmr.msra.gmra.mrb[0].mxu1 %vm89_vm1, %v87_v3  ;;  %436 = vmatprep.subr.bf16.mxu1 %v574_v1  ;;  %v443_v13 = vpack.c.bf16 %v249_v10, %v248_v9  ;;  %v250_v14 = vld [vmem:[#allocation8 + $0x20] sm:$0xff]  ;;  %v251_v15 = vld [vmem:[#allocation8 + $0x28] sm:$0xff]  ;;  %v252_v17 = vld [vmem:[#allocation8 + $0x30] sm:$0xff] }
  0x4d   :  { %398 = vmatprep.mubr.msk.f32.mxu1 %vm573_vm0, %v572_v0  ;;  %438 = vmatpush3.bf16.msra.mxu1 %v437_v7  ;;  %v446_v16 = vpack.c.bf16 %v251_v15, %v250_v14  ;;  %v253_v18 = vld [vmem:[#allocation8 + $0x38] sm:$0xff]  ;;  %v254_v20 = vld [vmem:[#allocation8 + $0x40] sm:$0xff]  ;;  %v255_v21 = vld [vmem:[#allocation8 + $0x48] sm:$0xff] }
  0x4e   :  { %441 = vmatpush3.bf16.msra.mxu0 %v440_v11  ;;  %v449_v19 = vpack.c.bf16 %v253_v18, %v252_v17  ;;  %v452_v22 = vpack.c.bf16 %v255_v21, %v254_v20  ;;  %v256_v23 = vld [vmem:[#allocation8 + $0x50] sm:$0xff]  ;;  %v257_v24 = vld [vmem:[#allocation8 + $0x58] sm:$0xff]  ;;  %v258_v26 = vld [vmem:[#allocation8 + $0x60] sm:$0xff] }
  0x4f   :  { %442 = vmatprep.subr.bf16.mxu0 %v574_v1  ;;  %v455_v25 = vpack.c.bf16 %v257_v24, %v256_v23  ;;  %v259_v27 = vld [vmem:[#allocation8 + $0x68] sm:$0xff]  ;;  %v260_v29 = vld [vmem:[#allocation8 + $0x70] sm:$0xff]  ;;  %v261_v30 = vld [vmem:[#allocation8 + $0x78] sm:$0xff] }
  0x50   :  { %399 = vmatmul.mubr.msk.f32.vlgmr.msra.gmra.mrb[2].mxu1 %vm163_vm2, %v84_v12  ;;  %v458_v28 = vpack.c.bf16 %v259_v27, %v258_v26  ;;  %v461_v31 = vpack.c.bf16 %v261_v30, %v260_v29  ;;  %v364_v35 = vld [vmem:[%s698_s4] ss:$0 sm:$0xff] }
  0x51   :  { %v365_v40 = vld [vmem:[%s700_s6] ss:$0 sm:$0xff] }
  0x52   :  { %444 = vmatpush3.bf16.msra.mxu0 %v443_v13  ;;  %v366_v44 = vld [vmem:[%s701_s7] ss:$0 sm:$0xff] }
  0x53   :  { %445 = vmatprep.subr.bf16.mxu0 %v574_v1 }
  0x56   :  { %447 = vmatpush3.bf16.msra.mxu0 %v446_v16 }
  0x57   :  { %448 = vmatprep.subr.bf16.mxu0 %v574_v1 }
  0x5a   :  { %450 = vmatpush3.bf16.msra.mxu0 %v449_v19 }
  0x5b   :  { %451 = vmatprep.subr.bf16.mxu0 %v574_v1 }
  0x5e   :  { %453 = vmatpush3.bf16.msra.mxu0 %v452_v22 }
  0x5f   :  { %454 = vmatprep.subr.bf16.mxu0 %v574_v1 }
  0x62   :  { %456 = vmatpush3.bf16.msra.mxu0 %v455_v25 }
  0x63   :  { %457 = vmatprep.subr.bf16.mxu0 %v574_v1 }
  0x66   :  { %459 = vmatpush3.bf16.msra.mxu0 %v458_v28 }
  0x67   :  { %460 = vmatprep.subr.bf16.mxu0 %v574_v1 }
  0x6a   :  { %462 = vmatpush3.bf16.msra.mxu0 %v461_v31 }
 0x11f   :  { %v159_v32 = vpop.f32.mrb[0].mxu1 }
 0x120   :  { %v393_v33 = vpop.f32.mrb[1].mxu1 }
 0x123   :  { %v233_v34 = vpop.f32.mrb[2].mxu1 }
 0x124   :  { %v234_v36 = vadd.f32 %v233_v34, %v159_v32  ;;  %v400_v37 = vpop.f32.mrb[3].mxu1 }
 0x126   :  { %v244_v38 = vadd.f32 %v364_v35, %v234_v36 }
 0x128   :  { %v245_v39 = vmax.f32 %v244_v38, 0.0 }
 0x12a   :  { %434 = vmatmul.mubr.f32.vlgmr.msra.gmra.mrb[0].mxu0 %v245_v39 }
 0x1fd   :  { %v335_v41 = vpop.f32.mrb[0].mxu0 }
 0x1fe   :  { %v336_v42 = vadd.f32 %v365_v40, %v335_v41  ;;  %v435_v43 = vpop.f32.mrb[1].mxu0 }
 0x200   :  { %v339_v45 = vmax.f32 %v336_v42, 0.0 }
 0x202   :  { %v347_v46 = vmul.f32 %v366_v44, %v339_v45 }
 0x204   :  { %348 = vadd.xlane.f32.xlu0 %v347_v46 }
 0x291   :  { %v349_v48 = vpop.xlane.xlu0 %348 }
 0x292   :  { %v352_v49 = vadd.f32 %v351_v47, %v349_v48 }
 0x294   :  { %354 = vst.msk [vmem:[%s703_s9] sm:$0xff] %vm353_vm3, %v352_v49 }
 0x295   :  { %359 = vsyncpa [#allocation4], 1 }
 0x296   :  { %360 = vsyncpa [#allocation6], 1 }
 0x297   :  { %361 = vsyncpa [#allocation9], 1 }

</bundles_post_ra>
